<compile_context>
chip_gen: v6e
topology: v6e:2x2x1
jax: 0.10.0
libtpu: 0.0.40
codegen_flags: <defaults>
</compile_context>

<pallas_src>
import functools

import jax
import jax.numpy as jnp
from jax import lax
from jax.experimental import pallas as pl
from jax.experimental.pallas import tpu as pltpu


def _bert_embed_kernel(ids_ref, tok_hbm, pos_ref, out_ref, gbuf, sems,
                       *, seq_len, batch, unroll):
    """One grid step produces one (seq_tile, batch-element) output block.

    ids_ref : (B*L,)    int32, SMEM (scalar prefetch, flattened)
    tok_hbm : (V, E)    token table, raw HBM ref (manual row-gather DMA)
    pos_ref : (TL, E)   positional tile, auto-pipelined (resident across b)
    out_ref : (TL, E)   output tile (rows b*L + t*TL ...)
    gbuf    : (2*TL, E) VMEM double-buffer for gathered token rows
    sems    : (2,)      byte-counting DMA semaphores, one per slot
    """
    t = pl.program_id(0)                 # outer: sequence tile ("parallel")
    b = pl.program_id(1)                 # inner: batch element ("arbitrary")
    TL = out_ref.shape[0]

    def start_gather(batch_idx, slot):
        row0 = batch_idx * seq_len + t * TL        # first id of this tile
        dst0 = slot * TL                           # first gbuf row of this slot

        def issue(l, carry):
            tok_id = ids_ref[row0 + l]
            pltpu.make_async_copy(
                tok_hbm.at[pl.ds(tok_id, 1), :],
                gbuf.at[pl.ds(dst0 + l, 1), :],
                sems.at[slot],
            ).start()
            return carry

        lax.fori_loop(0, TL, issue, None, unroll=unroll)

    slot = b & 1

    # First batch element of every sequence tile gathers its own rows
    # (self-priming per tile => no cross-tile dependency under megacore).
    @pl.when(b == 0)
    def _():
        start_gather(0, 0)

    # Prefetch the NEXT batch element's rows into the other slot *before*
    # waiting, so its HBM traffic overlaps this step's wait + add.
    @pl.when(b + 1 < batch)
    def _():
        start_gather(b + 1, 1 - slot)

    # Single aggregate wait: each (1, E) row copy signals E*itemsize bytes on
    # sems[slot]; one (TL, E)-shaped descriptor consumes all TL of them.
    off = pl.multiple_of(slot * TL, TL)
    pltpu.make_async_copy(
        tok_hbm.at[pl.ds(0, TL), :],
        gbuf.at[pl.ds(off, TL), :],
        sems.at[slot],
    ).wait()

    # token embedding + positional embedding; nn.Dropout(p=0.1) is identity in
    # eval mode and is reproduced as such.
    # TODO(synk): training-mode stochastic dropout (pltpu.prng_*) not implemented.
    out_ref[...] = gbuf[pl.ds(off, TL), :] + pos_ref[...]


def bert_embedding(sequence, token_table, pos_table, *, seq_tile=None):
    """BERTEmbedding forward (eval): token_table[sequence] + pos_table.

    sequence    : (B, L) integer ids
    token_table : (V, E) token embedding weight (padding_idx row already zero)
    pos_table   : (L, E) positional embedding weight (max_len == L)
    returns     : (B, L, E) in token_table.dtype
    """
    B, L = sequence.shape
    V, E = token_table.shape
    assert pos_table.shape == (L, E), "max_len must equal seq_len for the add"
    assert token_table.dtype == pos_table.dtype

    if seq_tile is None:
        seq_tile = min(L, 512)            # big tiles: fewer steps / barriers
    TL = int(seq_tile)
    assert L % TL == 0, "seq_len must be divisible by the sequence tile"
    assert TL % 8 == 0 or (B == 1 and TL == L), "seq tile must be a multiple of 8"
    assert V >= TL, "vocab must be >= sequence tile (wait-descriptor shape)"
    n_tiles = L // TL

    # Flatten ids to 1-D for scalar prefetch (2-D SMEM arrays pad rows to 8);
    # clamp so a bad id can never turn into an out-of-bounds HBM DMA.
    ids = jnp.clip(sequence.reshape(-1).astype(jnp.int32), 0, V - 1)

    itemsize = jnp.dtype(token_table.dtype).itemsize
    # gather double-buffer + double-buffered pos + double-buffered out blocks
    est_vmem = (2 * TL * E + 2 * TL * E + 2 * TL * E) * itemsize
    vmem_limit = int(min(max(2 * est_vmem, 32 * 1024 * 1024), 48 * 1024 * 1024))

    unroll = 8 if TL % 8 == 0 else 1

    kernel = functools.partial(
        _bert_embed_kernel, seq_len=L, batch=B, unroll=unroll)

    out2d = pl.pallas_call(
        kernel,
        out_shape=jax.ShapeDtypeStruct((B * L, E), token_table.dtype),
        grid_spec=pltpu.PrefetchScalarGridSpec(
            num_scalar_prefetch=1,                        # ids -> SMEM
            grid=(n_tiles, B),                            # t outer, b inner
            in_specs=[
                pl.BlockSpec(memory_space=pl.ANY),        # token table stays in HBM
                # pos block index is constant across the inner b axis -> stays
                # resident in VMEM, fetched once per sequence tile.
                pl.BlockSpec((TL, E), lambda t, b, ids: (t, 0)),
            ],
            out_specs=pl.BlockSpec(
                (TL, E), lambda t, b, ids: (b * n_tiles + t, 0)),
            scratch_shapes=[
                pltpu.VMEM((2 * TL, E), token_table.dtype),   # gather double-buffer
                pltpu.SemaphoreType.DMA((2,)),                # one aggregate sem/slot
            ],
        ),
        compiler_params=pltpu.CompilerParams(
            dimension_semantics=("parallel", "arbitrary"),
            vmem_limit_bytes=vmem_limit,
        ),
    )(ids, token_table, pos_table)

    return out2d.reshape(B, L, E)


if __name__ == "__main__":
    # Small shapes consistent with the module (E kept a multiple of 128 so the
    # output stores are lane-dense).
    B = 2      # batch
    L = 8      # seq_len == max_len
    E = 128    # embed_size
    V = 64     # vocab_size

    key = jax.random.PRNGKey(0)
    k_tok, k_pos, k_ids = jax.random.split(key, 3)

    # Deterministic synthetic parameters (shapes from __init__).
    token_table = jax.random.normal(k_tok, (V, E), dtype=jnp.float32) * 0.02
    token_table = token_table.at[0].set(0.0)      # padding_idx=0 -> zero row
    pos_table = jax.random.normal(k_pos, (L, E), dtype=jnp.float32) * 0.02

    sequence = jax.random.randint(k_ids, (B, L), 0, V, dtype=jnp.int32)

    out = bert_embedding(sequence, token_table, pos_table)
    out = jax.block_until_ready(out)

    # Reference check in plain JAX (token lookup + broadcast positional add).
    ref = token_table[sequence] + pos_table[None, :, :]
    assert out.shape == (B, L, E)
    assert jnp.allclose(out, ref, atol=1e-5), "mismatch vs reference"

    print("KERNEL_OK")
</pallas_src>

<mosaic_0001>
module attributes {stable_mosaic.version = 11 : i64} {
  func.func @_bert_embed_kernel(%arg0: i32, %arg1: i32, %arg2: memref<16xi32, #tpu.memory_space<smem>>, %arg3: memref<64x128xf32, #tpu.memory_space<any>>, %arg4: memref<8x128xf32, #tpu.memory_space<vmem>>, %arg5: memref<8x128xf32, #tpu.memory_space<vmem>>, %arg6: memref<16x128xf32, #tpu.memory_space<vmem>>, %arg7: memref<2x!tpu.dma_semaphore, #tpu.memory_space<semaphore_mem>>) attributes {dimension_semantics = [#tpu.dimension_semantics<parallel>, #tpu.dimension_semantics<arbitrary>], iteration_bounds = array<i64: 1, 2>, scalar_prefetch = 1 : i64, scratch_operands = 2 : i64, tpu.core_type = #tpu.core_type<tc>, window_params = [{}, {transform_indices = @transform_1, window_bounds = array<i64: 8, 128>}, {transform_indices = @transform_2, window_bounds = array<i64: 8, 128>}]} {
    %c1_i32 = arith.constant 1 : i32
    %0 = arith.andi %arg1, %c1_i32 : i32
    %c0_i32 = arith.constant 0 : i32
    %1 = arith.cmpi eq, %arg1, %c0_i32 : i32
    %2 = arith.extui %1 : i1 to i32
    %c0_i32_0 = arith.constant 0 : i32
    %3 = arith.cmpi ne, %2, %c0_i32_0 : i32
    scf.if %3 {
      %c8_i32_10 = arith.constant 8 : i32
      %19 = arith.muli %arg0, %c8_i32_10 : i32
      %c0_i32_11 = arith.constant 0 : i32
      %20 = arith.addi %c0_i32_11, %19 : i32
      %c0_i32_12 = arith.constant 0 : i32
      %21 = arith.addi %20, %c0_i32_12 : i32
      %22 = arith.index_cast %21 : i32 to index
      %23 = memref.load %arg2[%22] : memref<16xi32, #tpu.memory_space<smem>>
      %c0_i32_13 = arith.constant 0 : i32
      %24 = arith.addi %c0_i32_13, %c0_i32_12 : i32
      %c0_i32_14 = arith.constant 0 : i32
      %c0_i32_15 = arith.constant 0 : i32
      %25 = tpu.memref_slice %arg3[%23, %c0_i32_15] : memref<64x128xf32, #tpu.memory_space<any>> -> memref<1x128xf32, #tpu.memory_space<any>>
      %c0_i32_16 = arith.constant 0 : i32
      %26 = tpu.memref_slice %arg6[%24, %c0_i32_16] : memref<16x128xf32, #tpu.memory_space<vmem>> -> memref<1x128xf32, #tpu.memory_space<vmem>>
      %27 = tpu.memref_slice %arg7[%c0_i32_14] : memref<2x!tpu.dma_semaphore, #tpu.memory_space<semaphore_mem>> -> memref<1x!tpu.dma_semaphore, #tpu.memory_space<semaphore_mem>>
      %28 = tpu.memref_squeeze %27 : memref<1x!tpu.dma_semaphore, #tpu.memory_space<semaphore_mem>> -> memref<!tpu.dma_semaphore, #tpu.memory_space<semaphore_mem>>
      tpu.enqueue_dma source(%25 : memref<1x128xf32, #tpu.memory_space<any>>) target(%26 : memref<1x128xf32, #tpu.memory_space<vmem>>) target_semaphore(%28 : memref<!tpu.dma_semaphore, #tpu.memory_space<semaphore_mem>>)
      %c1_i32_17 = arith.constant 1 : i32
      %29 = arith.addi %20, %c1_i32_17 : i32
      %30 = arith.index_cast %29 : i32 to index
      %31 = memref.load %arg2[%30] : memref<16xi32, #tpu.memory_space<smem>>
      %c0_i32_18 = arith.constant 0 : i32
      %32 = arith.addi %c0_i32_18, %c1_i32_17 : i32
      %c0_i32_19 = arith.constant 0 : i32
      %c0_i32_20 = arith.constant 0 : i32
      %33 = tpu.memref_slice %arg3[%31, %c0_i32_20] : memref<64x128xf32, #tpu.memory_space<any>> -> memref<1x128xf32, #tpu.memory_space<any>>
      %c0_i32_21 = arith.constant 0 : i32
      %34 = tpu.memref_slice %arg6[%32, %c0_i32_21] : memref<16x128xf32, #tpu.memory_space<vmem>> -> memref<1x128xf32, #tpu.memory_space<vmem>>
      %35 = tpu.memref_slice %arg7[%c0_i32_19] : memref<2x!tpu.dma_semaphore, #tpu.memory_space<semaphore_mem>> -> memref<1x!tpu.dma_semaphore, #tpu.memory_space<semaphore_mem>>
      %36 = tpu.memref_squeeze %35 : memref<1x!tpu.dma_semaphore, #tpu.memory_space<semaphore_mem>> -> memref<!tpu.dma_semaphore, #tpu.memory_space<semaphore_mem>>
      tpu.enqueue_dma source(%33 : memref<1x128xf32, #tpu.memory_space<any>>) target(%34 : memref<1x128xf32, #tpu.memory_space<vmem>>) target_semaphore(%36 : memref<!tpu.dma_semaphore, #tpu.memory_space<semaphore_mem>>)
      %c2_i32_22 = arith.constant 2 : i32
      %37 = arith.addi %20, %c2_i32_22 : i32
      %38 = arith.index_cast %37 : i32 to index
      %39 = memref.load %arg2[%38] : memref<16xi32, #tpu.memory_space<smem>>
      %c0_i32_23 = arith.constant 0 : i32
      %40 = arith.addi %c0_i32_23, %c2_i32_22 : i32
      %c0_i32_24 = arith.constant 0 : i32
      %c0_i32_25 = arith.constant 0 : i32
      %41 = tpu.memref_slice %arg3[%39, %c0_i32_25] : memref<64x128xf32, #tpu.memory_space<any>> -> memref<1x128xf32, #tpu.memory_space<any>>
      %c0_i32_26 = arith.constant 0 : i32
      %42 = tpu.memref_slice %arg6[%40, %c0_i32_26] : memref<16x128xf32, #tpu.memory_space<vmem>> -> memref<1x128xf32, #tpu.memory_space<vmem>>
      %43 = tpu.memref_slice %arg7[%c0_i32_24] : memref<2x!tpu.dma_semaphore, #tpu.memory_space<semaphore_mem>> -> memref<1x!tpu.dma_semaphore, #tpu.memory_space<semaphore_mem>>
      %44 = tpu.memref_squeeze %43 : memref<1x!tpu.dma_semaphore, #tpu.memory_space<semaphore_mem>> -> memref<!tpu.dma_semaphore, #tpu.memory_space<semaphore_mem>>
      tpu.enqueue_dma source(%41 : memref<1x128xf32, #tpu.memory_space<any>>) target(%42 : memref<1x128xf32, #tpu.memory_space<vmem>>) target_semaphore(%44 : memref<!tpu.dma_semaphore, #tpu.memory_space<semaphore_mem>>)
      %c3_i32 = arith.constant 3 : i32
      %45 = arith.addi %20, %c3_i32 : i32
      %46 = arith.index_cast %45 : i32 to index
      %47 = memref.load %arg2[%46] : memref<16xi32, #tpu.memory_space<smem>>
      %c0_i32_27 = arith.constant 0 : i32
      %48 = arith.addi %c0_i32_27, %c3_i32 : i32
      %c0_i32_28 = arith.constant 0 : i32
      %c0_i32_29 = arith.constant 0 : i32
      %49 = tpu.memref_slice %arg3[%47, %c0_i32_29] : memref<64x128xf32, #tpu.memory_space<any>> -> memref<1x128xf32, #tpu.memory_space<any>>
      %c0_i32_30 = arith.constant 0 : i32
      %50 = tpu.memref_slice %arg6[%48, %c0_i32_30] : memref<16x128xf32, #tpu.memory_space<vmem>> -> memref<1x128xf32, #tpu.memory_space<vmem>>
      %51 = tpu.memref_slice %arg7[%c0_i32_28] : memref<2x!tpu.dma_semaphore, #tpu.memory_space<semaphore_mem>> -> memref<1x!tpu.dma_semaphore, #tpu.memory_space<semaphore_mem>>
      %52 = tpu.memref_squeeze %51 : memref<1x!tpu.dma_semaphore, #tpu.memory_space<semaphore_mem>> -> memref<!tpu.dma_semaphore, #tpu.memory_space<semaphore_mem>>
      tpu.enqueue_dma source(%49 : memref<1x128xf32, #tpu.memory_space<any>>) target(%50 : memref<1x128xf32, #tpu.memory_space<vmem>>) target_semaphore(%52 : memref<!tpu.dma_semaphore, #tpu.memory_space<semaphore_mem>>)
      %c4_i32 = arith.constant 4 : i32
      %53 = arith.addi %20, %c4_i32 : i32
      %54 = arith.index_cast %53 : i32 to index
      %55 = memref.load %arg2[%54] : memref<16xi32, #tpu.memory_space<smem>>
      %c0_i32_31 = arith.constant 0 : i32
      %56 = arith.addi %c0_i32_31, %c4_i32 : i32
      %c0_i32_32 = arith.constant 0 : i32
      %c0_i32_33 = arith.constant 0 : i32
      %57 = tpu.memref_slice %arg3[%55, %c0_i32_33] : memref<64x128xf32, #tpu.memory_space<any>> -> memref<1x128xf32, #tpu.memory_space<any>>
      %c0_i32_34 = arith.constant 0 : i32
      %58 = tpu.memref_slice %arg6[%56, %c0_i32_34] : memref<16x128xf32, #tpu.memory_space<vmem>> -> memref<1x128xf32, #tpu.memory_space<vmem>>
      %59 = tpu.memref_slice %arg7[%c0_i32_32] : memref<2x!tpu.dma_semaphore, #tpu.memory_space<semaphore_mem>> -> memref<1x!tpu.dma_semaphore, #tpu.memory_space<semaphore_mem>>
      %60 = tpu.memref_squeeze %59 : memref<1x!tpu.dma_semaphore, #tpu.memory_space<semaphore_mem>> -> memref<!tpu.dma_semaphore, #tpu.memory_space<semaphore_mem>>
      tpu.enqueue_dma source(%57 : memref<1x128xf32, #tpu.memory_space<any>>) target(%58 : memref<1x128xf32, #tpu.memory_space<vmem>>) target_semaphore(%60 : memref<!tpu.dma_semaphore, #tpu.memory_space<semaphore_mem>>)
      %c5_i32 = arith.constant 5 : i32
      %61 = arith.addi %20, %c5_i32 : i32
      %62 = arith.index_cast %61 : i32 to index
      %63 = memref.load %arg2[%62] : memref<16xi32, #tpu.memory_space<smem>>
      %c0_i32_35 = arith.constant 0 : i32
      %64 = arith.addi %c0_i32_35, %c5_i32 : i32
      %c0_i32_36 = arith.constant 0 : i32
      %c0_i32_37 = arith.constant 0 : i32
      %65 = tpu.memref_slice %arg3[%63, %c0_i32_37] : memref<64x128xf32, #tpu.memory_space<any>> -> memref<1x128xf32, #tpu.memory_space<any>>
      %c0_i32_38 = arith.constant 0 : i32
      %66 = tpu.memref_slice %arg6[%64, %c0_i32_38] : memref<16x128xf32, #tpu.memory_space<vmem>> -> memref<1x128xf32, #tpu.memory_space<vmem>>
      %67 = tpu.memref_slice %arg7[%c0_i32_36] : memref<2x!tpu.dma_semaphore, #tpu.memory_space<semaphore_mem>> -> memref<1x!tpu.dma_semaphore, #tpu.memory_space<semaphore_mem>>
      %68 = tpu.memref_squeeze %67 : memref<1x!tpu.dma_semaphore, #tpu.memory_space<semaphore_mem>> -> memref<!tpu.dma_semaphore, #tpu.memory_space<semaphore_mem>>
      tpu.enqueue_dma source(%65 : memref<1x128xf32, #tpu.memory_space<any>>) target(%66 : memref<1x128xf32, #tpu.memory_space<vmem>>) target_semaphore(%68 : memref<!tpu.dma_semaphore, #tpu.memory_space<semaphore_mem>>)
      %c6_i32 = arith.constant 6 : i32
      %69 = arith.addi %20, %c6_i32 : i32
      %70 = arith.index_cast %69 : i32 to index
      %71 = memref.load %arg2[%70] : memref<16xi32, #tpu.memory_space<smem>>
      %c0_i32_39 = arith.constant 0 : i32
      %72 = arith.addi %c0_i32_39, %c6_i32 : i32
      %c0_i32_40 = arith.constant 0 : i32
      %c0_i32_41 = arith.constant 0 : i32
      %73 = tpu.memref_slice %arg3[%71, %c0_i32_41] : memref<64x128xf32, #tpu.memory_space<any>> -> memref<1x128xf32, #tpu.memory_space<any>>
      %c0_i32_42 = arith.constant 0 : i32
      %74 = tpu.memref_slice %arg6[%72, %c0_i32_42] : memref<16x128xf32, #tpu.memory_space<vmem>> -> memref<1x128xf32, #tpu.memory_space<vmem>>
      %75 = tpu.memref_slice %arg7[%c0_i32_40] : memref<2x!tpu.dma_semaphore, #tpu.memory_space<semaphore_mem>> -> memref<1x!tpu.dma_semaphore, #tpu.memory_space<semaphore_mem>>
      %76 = tpu.memref_squeeze %75 : memref<1x!tpu.dma_semaphore, #tpu.memory_space<semaphore_mem>> -> memref<!tpu.dma_semaphore, #tpu.memory_space<semaphore_mem>>
      tpu.enqueue_dma source(%73 : memref<1x128xf32, #tpu.memory_space<any>>) target(%74 : memref<1x128xf32, #tpu.memory_space<vmem>>) target_semaphore(%76 : memref<!tpu.dma_semaphore, #tpu.memory_space<semaphore_mem>>)
      %c7_i32 = arith.constant 7 : i32
      %77 = arith.addi %20, %c7_i32 : i32
      %78 = arith.index_cast %77 : i32 to index
      %79 = memref.load %arg2[%78] : memref<16xi32, #tpu.memory_space<smem>>
      %c0_i32_43 = arith.constant 0 : i32
      %80 = arith.addi %c0_i32_43, %c7_i32 : i32
      %c0_i32_44 = arith.constant 0 : i32
      %c0_i32_45 = arith.constant 0 : i32
      %81 = tpu.memref_slice %arg3[%79, %c0_i32_45] : memref<64x128xf32, #tpu.memory_space<any>> -> memref<1x128xf32, #tpu.memory_space<any>>
      %c0_i32_46 = arith.constant 0 : i32
      %82 = tpu.memref_slice %arg6[%80, %c0_i32_46] : memref<16x128xf32, #tpu.memory_space<vmem>> -> memref<1x128xf32, #tpu.memory_space<vmem>>
      %83 = tpu.memref_slice %arg7[%c0_i32_44] : memref<2x!tpu.dma_semaphore, #tpu.memory_space<semaphore_mem>> -> memref<1x!tpu.dma_semaphore, #tpu.memory_space<semaphore_mem>>
      %84 = tpu.memref_squeeze %83 : memref<1x!tpu.dma_semaphore, #tpu.memory_space<semaphore_mem>> -> memref<!tpu.dma_semaphore, #tpu.memory_space<semaphore_mem>>
      tpu.enqueue_dma source(%81 : memref<1x128xf32, #tpu.memory_space<any>>) target(%82 : memref<1x128xf32, #tpu.memory_space<vmem>>) target_semaphore(%84 : memref<!tpu.dma_semaphore, #tpu.memory_space<semaphore_mem>>)
      %c8_i32_47 = arith.constant 8 : i32
    } else {
    }
    %c1_i32_1 = arith.constant 1 : i32
    %4 = arith.addi %arg1, %c1_i32_1 : i32
    %c2_i32 = arith.constant 2 : i32
    %5 = arith.cmpi slt, %4, %c2_i32 : i32
    %6 = arith.extui %5 : i1 to i32
    %c0_i32_2 = arith.constant 0 : i32
    %7 = arith.cmpi ne, %6, %c0_i32_2 : i32
    scf.if %7 {
      %c1_i32_10 = arith.constant 1 : i32
      %19 = arith.addi %arg1, %c1_i32_10 : i32
      %c1_i32_11 = arith.constant 1 : i32
      %20 = arith.subi %c1_i32_11, %0 : i32
      %c8_i32_12 = arith.constant 8 : i32
      %21 = arith.muli %19, %c8_i32_12 : i32
      %c8_i32_13 = arith.constant 8 : i32
      %22 = arith.muli %arg0, %c8_i32_13 : i32
      %23 = arith.addi %21, %22 : i32
      %c8_i32_14 = arith.constant 8 : i32
      %24 = arith.muli %20, %c8_i32_14 : i32
      %c0_i32_15 = arith.constant 0 : i32
      %25 = arith.addi %23, %c0_i32_15 : i32
      %26 = arith.index_cast %25 : i32 to index
      %27 = memref.load %arg2[%26] : memref<16xi32, #tpu.memory_space<smem>>
      %28 = arith.addi %24, %c0_i32_15 : i32
      %c0_i32_16 = arith.constant 0 : i32
      %29 = tpu.memref_slice %arg3[%27, %c0_i32_16] : memref<64x128xf32, #tpu.memory_space<any>> -> memref<1x128xf32, #tpu.memory_space<any>>
      %c0_i32_17 = arith.constant 0 : i32
      %30 = tpu.memref_slice %arg6[%28, %c0_i32_17] : memref<16x128xf32, #tpu.memory_space<vmem>> -> memref<1x128xf32, #tpu.memory_space<vmem>>
      %31 = tpu.memref_slice %arg7[%20] : memref<2x!tpu.dma_semaphore, #tpu.memory_space<semaphore_mem>> -> memref<1x!tpu.dma_semaphore, #tpu.memory_space<semaphore_mem>>
      %32 = tpu.memref_squeeze %31 : memref<1x!tpu.dma_semaphore, #tpu.memory_space<semaphore_mem>> -> memref<!tpu.dma_semaphore, #tpu.memory_space<semaphore_mem>>
      tpu.enqueue_dma source(%29 : memref<1x128xf32, #tpu.memory_space<any>>) target(%30 : memref<1x128xf32, #tpu.memory_space<vmem>>) target_semaphore(%32 : memref<!tpu.dma_semaphore, #tpu.memory_space<semaphore_mem>>)
      %c1_i32_18 = arith.constant 1 : i32
      %33 = arith.addi %23, %c1_i32_18 : i32
      %34 = arith.index_cast %33 : i32 to index
      %35 = memref.load %arg2[%34] : memref<16xi32, #tpu.memory_space<smem>>
      %36 = arith.addi %24, %c1_i32_18 : i32
      %c0_i32_19 = arith.constant 0 : i32
      %37 = tpu.memref_slice %arg3[%35, %c0_i32_19] : memref<64x128xf32, #tpu.memory_space<any>> -> memref<1x128xf32, #tpu.memory_space<any>>
      %c0_i32_20 = arith.constant 0 : i32
      %38 = tpu.memref_slice %arg6[%36, %c0_i32_20] : memref<16x128xf32, #tpu.memory_space<vmem>> -> memref<1x128xf32, #tpu.memory_space<vmem>>
      %39 = tpu.memref_slice %arg7[%20] : memref<2x!tpu.dma_semaphore, #tpu.memory_space<semaphore_mem>> -> memref<1x!tpu.dma_semaphore, #tpu.memory_space<semaphore_mem>>
      %40 = tpu.memref_squeeze %39 : memref<1x!tpu.dma_semaphore, #tpu.memory_space<semaphore_mem>> -> memref<!tpu.dma_semaphore, #tpu.memory_space<semaphore_mem>>
      tpu.enqueue_dma source(%37 : memref<1x128xf32, #tpu.memory_space<any>>) target(%38 : memref<1x128xf32, #tpu.memory_space<vmem>>) target_semaphore(%40 : memref<!tpu.dma_semaphore, #tpu.memory_space<semaphore_mem>>)
      %c2_i32_21 = arith.constant 2 : i32
      %41 = arith.addi %23, %c2_i32_21 : i32
      %42 = arith.index_cast %41 : i32 to index
      %43 = memref.load %arg2[%42] : memref<16xi32, #tpu.memory_space<smem>>
      %44 = arith.addi %24, %c2_i32_21 : i32
      %c0_i32_22 = arith.constant 0 : i32
      %45 = tpu.memref_slice %arg3[%43, %c0_i32_22] : memref<64x128xf32, #tpu.memory_space<any>> -> memref<1x128xf32, #tpu.memory_space<any>>
      %c0_i32_23 = arith.constant 0 : i32
      %46 = tpu.memref_slice %arg6[%44, %c0_i32_23] : memref<16x128xf32, #tpu.memory_space<vmem>> -> memref<1x128xf32, #tpu.memory_space<vmem>>
      %47 = tpu.memref_slice %arg7[%20] : memref<2x!tpu.dma_semaphore, #tpu.memory_space<semaphore_mem>> -> memref<1x!tpu.dma_semaphore, #tpu.memory_space<semaphore_mem>>
      %48 = tpu.memref_squeeze %47 : memref<1x!tpu.dma_semaphore, #tpu.memory_space<semaphore_mem>> -> memref<!tpu.dma_semaphore, #tpu.memory_space<semaphore_mem>>
      tpu.enqueue_dma source(%45 : memref<1x128xf32, #tpu.memory_space<any>>) target(%46 : memref<1x128xf32, #tpu.memory_space<vmem>>) target_semaphore(%48 : memref<!tpu.dma_semaphore, #tpu.memory_space<semaphore_mem>>)
      %c3_i32 = arith.constant 3 : i32
      %49 = arith.addi %23, %c3_i32 : i32
      %50 = arith.index_cast %49 : i32 to index
      %51 = memref.load %arg2[%50] : memref<16xi32, #tpu.memory_space<smem>>
      %52 = arith.addi %24, %c3_i32 : i32
      %c0_i32_24 = arith.constant 0 : i32
      %53 = tpu.memref_slice %arg3[%51, %c0_i32_24] : memref<64x128xf32, #tpu.memory_space<any>> -> memref<1x128xf32, #tpu.memory_space<any>>
      %c0_i32_25 = arith.constant 0 : i32
      %54 = tpu.memref_slice %arg6[%52, %c0_i32_25] : memref<16x128xf32, #tpu.memory_space<vmem>> -> memref<1x128xf32, #tpu.memory_space<vmem>>
      %55 = tpu.memref_slice %arg7[%20] : memref<2x!tpu.dma_semaphore, #tpu.memory_space<semaphore_mem>> -> memref<1x!tpu.dma_semaphore, #tpu.memory_space<semaphore_mem>>
      %56 = tpu.memref_squeeze %55 : memref<1x!tpu.dma_semaphore, #tpu.memory_space<semaphore_mem>> -> memref<!tpu.dma_semaphore, #tpu.memory_space<semaphore_mem>>
      tpu.enqueue_dma source(%53 : memref<1x128xf32, #tpu.memory_space<any>>) target(%54 : memref<1x128xf32, #tpu.memory_space<vmem>>) target_semaphore(%56 : memref<!tpu.dma_semaphore, #tpu.memory_space<semaphore_mem>>)
      %c4_i32 = arith.constant 4 : i32
      %57 = arith.addi %23, %c4_i32 : i32
      %58 = arith.index_cast %57 : i32 to index
      %59 = memref.load %arg2[%58] : memref<16xi32, #tpu.memory_space<smem>>
      %60 = arith.addi %24, %c4_i32 : i32
      %c0_i32_26 = arith.constant 0 : i32
      %61 = tpu.memref_slice %arg3[%59, %c0_i32_26] : memref<64x128xf32, #tpu.memory_space<any>> -> memref<1x128xf32, #tpu.memory_space<any>>
      %c0_i32_27 = arith.constant 0 : i32
      %62 = tpu.memref_slice %arg6[%60, %c0_i32_27] : memref<16x128xf32, #tpu.memory_space<vmem>> -> memref<1x128xf32, #tpu.memory_space<vmem>>
      %63 = tpu.memref_slice %arg7[%20] : memref<2x!tpu.dma_semaphore, #tpu.memory_space<semaphore_mem>> -> memref<1x!tpu.dma_semaphore, #tpu.memory_space<semaphore_mem>>
      %64 = tpu.memref_squeeze %63 : memref<1x!tpu.dma_semaphore, #tpu.memory_space<semaphore_mem>> -> memref<!tpu.dma_semaphore, #tpu.memory_space<semaphore_mem>>
      tpu.enqueue_dma source(%61 : memref<1x128xf32, #tpu.memory_space<any>>) target(%62 : memref<1x128xf32, #tpu.memory_space<vmem>>) target_semaphore(%64 : memref<!tpu.dma_semaphore, #tpu.memory_space<semaphore_mem>>)
      %c5_i32 = arith.constant 5 : i32
      %65 = arith.addi %23, %c5_i32 : i32
      %66 = arith.index_cast %65 : i32 to index
      %67 = memref.load %arg2[%66] : memref<16xi32, #tpu.memory_space<smem>>
      %68 = arith.addi %24, %c5_i32 : i32
      %c0_i32_28 = arith.constant 0 : i32
      %69 = tpu.memref_slice %arg3[%67, %c0_i32_28] : memref<64x128xf32, #tpu.memory_space<any>> -> memref<1x128xf32, #tpu.memory_space<any>>
      %c0_i32_29 = arith.constant 0 : i32
      %70 = tpu.memref_slice %arg6[%68, %c0_i32_29] : memref<16x128xf32, #tpu.memory_space<vmem>> -> memref<1x128xf32, #tpu.memory_space<vmem>>
      %71 = tpu.memref_slice %arg7[%20] : memref<2x!tpu.dma_semaphore, #tpu.memory_space<semaphore_mem>> -> memref<1x!tpu.dma_semaphore, #tpu.memory_space<semaphore_mem>>
      %72 = tpu.memref_squeeze %71 : memref<1x!tpu.dma_semaphore, #tpu.memory_space<semaphore_mem>> -> memref<!tpu.dma_semaphore, #tpu.memory_space<semaphore_mem>>
      tpu.enqueue_dma source(%69 : memref<1x128xf32, #tpu.memory_space<any>>) target(%70 : memref<1x128xf32, #tpu.memory_space<vmem>>) target_semaphore(%72 : memref<!tpu.dma_semaphore, #tpu.memory_space<semaphore_mem>>)
      %c6_i32 = arith.constant 6 : i32
      %73 = arith.addi %23, %c6_i32 : i32
      %74 = arith.index_cast %73 : i32 to index
      %75 = memref.load %arg2[%74] : memref<16xi32, #tpu.memory_space<smem>>
      %76 = arith.addi %24, %c6_i32 : i32
      %c0_i32_30 = arith.constant 0 : i32
      %77 = tpu.memref_slice %arg3[%75, %c0_i32_30] : memref<64x128xf32, #tpu.memory_space<any>> -> memref<1x128xf32, #tpu.memory_space<any>>
      %c0_i32_31 = arith.constant 0 : i32
      %78 = tpu.memref_slice %arg6[%76, %c0_i32_31] : memref<16x128xf32, #tpu.memory_space<vmem>> -> memref<1x128xf32, #tpu.memory_space<vmem>>
      %79 = tpu.memref_slice %arg7[%20] : memref<2x!tpu.dma_semaphore, #tpu.memory_space<semaphore_mem>> -> memref<1x!tpu.dma_semaphore, #tpu.memory_space<semaphore_mem>>
      %80 = tpu.memref_squeeze %79 : memref<1x!tpu.dma_semaphore, #tpu.memory_space<semaphore_mem>> -> memref<!tpu.dma_semaphore, #tpu.memory_space<semaphore_mem>>
      tpu.enqueue_dma source(%77 : memref<1x128xf32, #tpu.memory_space<any>>) target(%78 : memref<1x128xf32, #tpu.memory_space<vmem>>) target_semaphore(%80 : memref<!tpu.dma_semaphore, #tpu.memory_space<semaphore_mem>>)
      %c7_i32 = arith.constant 7 : i32
      %81 = arith.addi %23, %c7_i32 : i32
      %82 = arith.index_cast %81 : i32 to index
      %83 = memref.load %arg2[%82] : memref<16xi32, #tpu.memory_space<smem>>
      %84 = arith.addi %24, %c7_i32 : i32
      %c0_i32_32 = arith.constant 0 : i32
      %85 = tpu.memref_slice %arg3[%83, %c0_i32_32] : memref<64x128xf32, #tpu.memory_space<any>> -> memref<1x128xf32, #tpu.memory_space<any>>
      %c0_i32_33 = arith.constant 0 : i32
      %86 = tpu.memref_slice %arg6[%84, %c0_i32_33] : memref<16x128xf32, #tpu.memory_space<vmem>> -> memref<1x128xf32, #tpu.memory_space<vmem>>
      %87 = tpu.memref_slice %arg7[%20] : memref<2x!tpu.dma_semaphore, #tpu.memory_space<semaphore_mem>> -> memref<1x!tpu.dma_semaphore, #tpu.memory_space<semaphore_mem>>
      %88 = tpu.memref_squeeze %87 : memref<1x!tpu.dma_semaphore, #tpu.memory_space<semaphore_mem>> -> memref<!tpu.dma_semaphore, #tpu.memory_space<semaphore_mem>>
      tpu.enqueue_dma source(%85 : memref<1x128xf32, #tpu.memory_space<any>>) target(%86 : memref<1x128xf32, #tpu.memory_space<vmem>>) target_semaphore(%88 : memref<!tpu.dma_semaphore, #tpu.memory_space<semaphore_mem>>)
      %c8_i32_34 = arith.constant 8 : i32
    } else {
    }
    %c8_i32 = arith.constant 8 : i32
    %8 = arith.muli %0, %c8_i32 : i32
    %9 = tpu.assume_multiple %8, 8 : i32
    %c0_i32_3 = arith.constant 0 : i32
    %c0_i32_4 = arith.constant 0 : i32
    %10 = tpu.memref_slice %arg3[%c0_i32_3, %c0_i32_4] : memref<64x128xf32, #tpu.memory_space<any>> -> memref<8x128xf32, #tpu.memory_space<any>>
    %c0_i32_5 = arith.constant 0 : i32
    %11 = tpu.memref_slice %arg6[%9, %c0_i32_5] : memref<16x128xf32, #tpu.memory_space<vmem>> -> memref<8x128xf32, #tpu.memory_space<vmem>>
    %12 = tpu.memref_slice %arg7[%0] : memref<2x!tpu.dma_semaphore, #tpu.memory_space<semaphore_mem>> -> memref<1x!tpu.dma_semaphore, #tpu.memory_space<semaphore_mem>>
    %13 = tpu.memref_squeeze %12 : memref<1x!tpu.dma_semaphore, #tpu.memory_space<semaphore_mem>> -> memref<!tpu.dma_semaphore, #tpu.memory_space<semaphore_mem>>
    tpu.wait_dma2 semaphore(%13 : memref<!tpu.dma_semaphore, #tpu.memory_space<semaphore_mem>>) src(%10 : memref<8x128xf32, #tpu.memory_space<any>>) dst(%11 : memref<8x128xf32, #tpu.memory_space<vmem>>)
    %14 = arith.index_cast %9 : i32 to index
    %c0 = arith.constant 0 : index
    %15 = vector.load %arg6[%14, %c0] : memref<16x128xf32, #tpu.memory_space<vmem>>, vector<8x128xf32>
    %c0_6 = arith.constant 0 : index
    %c0_7 = arith.constant 0 : index
    %16 = vector.load %arg4[%c0_6, %c0_7] : memref<8x128xf32, #tpu.memory_space<vmem>>, vector<8x128xf32>
    %17 = arith.addf %15, %16 : vector<8x128xf32>
    %c0_8 = arith.constant 0 : index
    %c0_9 = arith.constant 0 : index
    %18 = vector.load %arg5[%c0_8, %c0_9] : memref<8x128xf32, #tpu.memory_space<vmem>>, vector<8x128xf32>
    tpu.vector_store %arg5[%c0_8, %c0_9], %17 {strides = array<i32>} : memref<8x128xf32, #tpu.memory_space<vmem>>, vector<8x128xf32>,
    return
  }
  func.func @transform_1(%arg0: i32, %arg1: i32, %arg2: memref<16xi32, #tpu.memory_space<smem>>) -> (i32, i32) {
    %c0_i32 = arith.constant 0 : i32
    %c0_i32_0 = arith.constant 0 : i32
    return %arg0, %c0_i32 : i32, i32
  }
  func.func @transform_2(%arg0: i32, %arg1: i32, %arg2: memref<16xi32, #tpu.memory_space<smem>>) -> (i32, i32) {
    %c1_i32 = arith.constant 1 : i32
    %0 = arith.muli %arg1, %c1_i32 : i32
    %1 = arith.addi %0, %arg0 : i32
    %c0_i32 = arith.constant 0 : i32
    %c0_i32_0 = arith.constant 0 : i32
    return %1, %c0_i32 : i32, i32
  }
}

</mosaic_0001>

<bundles_post_ra>
// kernel: tpu_custom_call.1
= control target key start
LH: loop header
LB: loop body
LE: loop exit
PB: predicated region body
PF: predicated region fallthrough
CT: control target
= control target key end

     0   :  { %s1277_s12 = smov [#allocation5]   ;;  %s1842_s0 = inlined_call_operand.hbm [shape: s32[16], index: 0, kind: input, shape index: {}]   ;;  %s1843_s1 = inlined_call_operand.hbm [shape: f32[64,128], index: 1, kind: input, shape index: {}]   ;;  %s1844_s2 = inlined_call_operand.hbm [shape: f32[8,128], index: 2, kind: input, shape index: {}]   ;;  %s1845_s3 = inlined_call_operand.hbm [shape: f32[16,128], index: 3, kind: output, shape index: {}]  }
   0x1   :  { %1852 = sst [smem:[#allocation62_spill]] %s1844_s2 }
   0x2   :  { %9 = dma.hbm_to_smem %s1842_s0, 16, %s1277_s12, [#allocation4] }
   0x3   :  { %1241 = dma.done.wait [#allocation4], 16 }
   0x4   :  { %1242 = vsyncadd [#allocation4], 4294967280 }
   0x5   :  { %11 = sfence }
   0x6   :  { %12 = vsyncpa [#allocation7], 0 }
   0x7   :  { %13 = vsyncpa [#allocation8], 0 }
   0x8   :  { %15 = vsyncpa [#allocation8 + $0x1], 0  ;;  %s1311_s15 = smov 0   ;;  %s1313_s16 = smov 0  }
   0x9   :  { %s1315_s17 = smov 0   ;;  %s1317_s18 = smov 0  }
   0xa   :  { %s1319_s19 = smov 0   ;;  %s1321_s20 = smov 0  }
   0xb LB: > { %1853 = sst [smem:[#allocation56_spill]] %s1255_s15  ;;  %s580_s0 = sadd.s32 4294967295, %s1275_s20   ;;  %s1275_s20 = sphi %s1321_s20, %s21_s20   ;;  %s1271_s19 = sphi %s1319_s19, %s1876_s19   ;;  %s1267_s18 = sphi %s1317_s18, %s1872_s18   ;;  %s1263_s17 = sphi %s1315_s17, %s1871_s17   ;;  %s1259_s16 = sphi %s1313_s16, %s1875_s16   ;;  %s1255_s15 = sphi %s1311_s15, %s1874_s15  }
   0xc   : > { %1854 = sst [smem:[#allocation57_spill]] %s1263_s17  ;;  %s581_s21 = sadd.s32 4294967294, %s1275_s20  }
   0xd   : > { %1855 = sst [smem:[#allocation58_spill]] %s1271_s19  ;;  %s30_s22 = sadd.s32 1, %s1271_s19 }
   0xe   : > { %s68_s23 = sadd.s32 1, %s1263_s17  ;;  %p31_p0 = scmp.ge.s32.totalorder %s30_s22, 2 }
   0xf   : > { %p78_p1 = scmp.ne.s32.totalorder %s1263_s17, %s1259_s16  ;;  %p79_p2 = scmp.eq.s32.totalorder %s580_s0, 1 }
  0x10   : > { %p84_p3 = scmp.ne.s32.totalorder %s1259_s16, %s1255_s15  ;;  %s1878_s22 = smov (%p31_p0, %s30_s22), 0 }
  0x11   : > { %1856 = sst [smem:[#allocation59_spill]] %s1878_s22  ;;  %p1351_p4 = por %p79_p2, %p78_p1 }
  0x12   : > { %p85_p5 = scmp.eq.s32.totalorder %s581_s21, 1  ;;  %s65_s25 = ssub.s32 %s1271_s19, %s1878_s22 }
  0x13   : > { %p582_p6 = scmp.ge.s32.totalorder %s1275_s20, 1  ;;  %p66_p7 = scmp.eq.s32.totalorder %s65_s25, 0 }
  0x14   : > { %p1358_p8 = por %p85_p5, %p84_p3  ;;  %p92_p9 = scmp.lt.s32.totalorder %s1275_s20, 3 }
  0x15   : > { %s1364_s27 = scalar_select %p66_p7, %s1263_s17, %s68_s23  }
  0x16   : > { %s1858_s26 = scalar_select %p1358_p8, 1, 0 }
  0x17   : > { %1860 = sst [smem:[#allocation61_spill]] %s1364_s27  ;;  %p1366_p10 = pnand %p582_p6, %p92_p9 }
  0x18   : > { %1859 = sst [smem:[#allocation60_spill]] %s1858_s26  ;;  %p1370_p11 = scmp.eq.s32.totalorder %s580_s0, 0 }
  0x19   : > { %p670_p12 = pneg %p1366_p10  ;;  %s1278_s30 = smov [#allocation6]  }
  0x1a   : > { %s107_s4 = sshll.u32 %s1278_s30, 4  ;;  %s108_s4 = int_to_ptr.vmem [resolvable:$true] %s107_s4 }
  0x1b   : > { %p671_p13 = pnand %p1370_p11, %p670_p12  ;;  %s760_s5 = scalar_lea.vmem %s108_s4, 128 }
  0x1c   : > { %p761_p1 = scmp.ne.s32.totalorder %s108_s4, %s760_s5  ;;  %p768_p5 = scmp.lt.s32.totalorder %s108_s4, %s108_s4 }
  0x1d   : > { %p751_p0 = pneg %p671_p13  ;;  %p769_p6 = scmp.lt.s32.totalorder %s760_s5, %s760_s5 }
  0x1f   : > { %p763_p2 = pnand %p761_p1, %p751_p0  ;;  %p770_p7 = por %p769_p6, %p768_p5 }
  0x21   : > { %p764_p3 = pneg %p763_p2 }
  0x23   : > { %p771_p9 = pnand %p770_p7, %p764_p3 }
  0x25   : > { %774 = shalt.err (!%p771_p9)
}
  0x26   : > { %s1863_s2 = sld [smem:[#allocation62_spill]] }
  0x28   : > { %120 = sbr.rel (%p1366_p10) target bundleno = 474 (0x1da), region = 24 }
  0x2c   : > { %673 = dma.hbm_to_vmem [thread:$0]  (!%p671_p13), %s1863_s2, 128, %s108_s4, [#allocation7]  }
  0x2d   : > { %1244 = dma.done.wait (%p1370_p11), [#allocation7], 128  }
  0x2e   : > { %1246 = vsyncadd (%p1370_p11), [#allocation7], 4294967168  ;;  %s1846_s8 = sand.u32 1, %s1259_s16   ;;  %p680_p12 = scmp.eq.s32.totalorder %s1267_s18, 0 }
  0x2f   : > { %s1390_s9 = sshll.u32 %s1846_s8, 3  ;;  %s142_s10 = sld [smem:[#allocation5]] }
  0x30   : > { %s1393_s11 = sld [smem:[#allocation5 + $0x1]]  ;;  %s1279_s12 = smov [#allocation2]  }
  0x31   : > { %s152_s13 = sshll.u32 %s1279_s12, 4  ;;  %s1280_s14 = smov [#allocation2 + $0x1]   ;;  %s1395_s13 = int_to_ptr.vmem [resolvable:$true] %s152_s13 }
  0x32   : > { %s168_s0 = sshll.u32 %s1280_s14, 4  ;;  %s1399_s21 = sld [smem:[#allocation5 + $0x2]]  ;;  %s1397_s0 = int_to_ptr.vmem [resolvable:$true] %s168_s0 }
  0x33   : > { %s1401_s23 = sld [smem:[#allocation5 + $0x3]]  ;;  %s1281_s28 = smov [#allocation2 + $0x2]  }
  0x34   : > { %s184_s29 = sshll.u32 %s1281_s28, 4  ;;  %s1412_s8 = scalar_lea.hbm %s1843_s1, 1024  ;;  %s1434_s29 = int_to_ptr.vmem [resolvable:$true] %s184_s29 }
  0x35   : > { %s588_s25 = sshll.u32 %s142_s10, 4 }
  0x36   : > { %s144_s5 = scalar_lea.hbm %s1843_s1, %s588_s25  ;;  %s590_s6 = sshll.u32 %s1393_s11, 4 }
  0x37   : > { %s775_s7 = scalar_lea.hbm %s144_s5, 16  ;;  %p780_p0 = scmp.lt.s32.totalorder %s144_s5, %s1843_s1 }
  0x38   : > { %p776_p10 = scmp.ne.s32.totalorder %s144_s5, %s775_s7  ;;  %p781_p1 = scmp.lt.s32.totalorder %s1412_s8, %s775_s7 }
  0x3a   : > { %p777_p11 = pnand %p776_p10, %p680_p12  ;;  %p782_p2 = por %p781_p1, %p780_p0 }
  0x3c   : > { %p778_p13 = pneg %p777_p11 }
  0x3e   : > { %p783_p3 = pnand %p782_p2, %p778_p13 }
  0x40   : > { %786 = shalt.err (!%p783_p3)  }
  0x41   : > { %s787_s10 = scalar_lea.vmem %s1395_s13, 16  ;;  %s1423_s11 = scalar_lea.vmem %s1395_s13, 256 }
  0x42   : > { %p788_p5 = scmp.ne.s32.totalorder %s1395_s13, %s787_s10  ;;  %p794_p9 = scmp.lt.s32.totalorder %s1395_s13, %s1395_s13 }
  0x43   : > { %p795_p10 = scmp.lt.s32.totalorder %s1423_s11, %s787_s10 }
  0x44   : > { %p789_p6 = pnand %p788_p5, %p680_p12 }
  0x45   : > { %p796_p11 = por %p795_p10, %p794_p9 }
  0x46   : > { %p790_p7 = pneg %p789_p6 }
  0x48   : > { %p797_p0 = pnand %p796_p11, %p790_p7 }
  0x4a   : > { %800 = shalt.err (!%p797_p0)  }
  0x4b   : > { %635 = dma.hbm_to_vmem [thread:$0]  (%p680_p12), %s144_s5, 16, %s1395_s13, [#allocation3] }
  0x4c   : > { %s159_s25 = scalar_lea.hbm %s1843_s1, %s590_s6 }
  0x4d   : > { %s801_s28 = scalar_lea.hbm %s159_s25, 16  ;;  %p806_p3 = scmp.lt.s32.totalorder %s159_s25, %s1843_s1 }
  0x4e   : > { %p802_p13 = scmp.ne.s32.totalorder %s159_s25, %s801_s28  ;;  %p807_p5 = scmp.lt.s32.totalorder %s1412_s8, %s801_s28 }
  0x50   : > { %p803_p1 = pnand %p802_p13, %p680_p12  ;;  %p808_p6 = por %p807_p5, %p806_p3 }
  0x52   : > { %p804_p2 = pneg %p803_p1 }
  0x54   : > { %p809_p7 = pnand %p808_p6, %p804_p2 }
  0x56   : > { %812 = shalt.err (!%p809_p7)  }
  0x57   : > { %s813_s5 = scalar_lea.vmem %s1397_s0, 16  ;;  %p820_p0 = scmp.lt.s32.totalorder %s1397_s0, %s1395_s13 }
  0x58   : > { %p814_p9 = scmp.ne.s32.totalorder %s1397_s0, %s813_s5  ;;  %p821_p13 = scmp.lt.s32.totalorder %s1423_s11, %s813_s5 }
  0x5a   : > { %p815_p10 = pnand %p814_p9, %p680_p12  ;;  %p822_p1 = por %p821_p13, %p820_p0 }
  0x5c   : > { %p816_p11 = pneg %p815_p10 }
  0x5e   : > { %p823_p8 = pnand %p822_p1, %p816_p11 }
  0x60   : > { %826 = shalt.err (!%p823_p8)  }
  0x61   : > { %636 = dma.hbm_to_vmem [thread:$0]  (%p680_p12), %s159_s25, 16, %s1397_s0, [#allocation3] }
  0x62   : > { %s592_s6 = sshll.u32 %s1399_s21, 4  ;;  %s594_s7 = sshll.u32 %s1401_s23, 4 }
  0x63   : > { %s175_s10 = scalar_lea.hbm %s1843_s1, %s592_s6  ;;  %s1460_s28 = scalar_lea.hbm %s1843_s1, %s594_s7 }
  0x64   : > { %s827_s30 = scalar_lea.hbm %s175_s10, 16  ;;  %p832_p5 = scmp.lt.s32.totalorder %s175_s10, %s1843_s1 }
  0x65   : > { %p828_p8 = scmp.ne.s32.totalorder %s175_s10, %s827_s30  ;;  %p833_p6 = scmp.lt.s32.totalorder %s1412_s8, %s827_s30 }
  0x67   : > { %p829_p2 = pnand %p828_p8, %p680_p12  ;;  %p834_p7 = por %p833_p6, %p832_p5 }
  0x69   : > { %p830_p3 = pneg %p829_p2 }
  0x6b   : > { %p835_p9 = pnand %p834_p7, %p830_p3 }
  0x6d   : > { %838 = shalt.err (!%p835_p9)  }
  0x6e   : > { %s839_s0 = scalar_lea.vmem %s1434_s29, 16  ;;  %p846_p13 = scmp.lt.s32.totalorder %s1434_s29, %s1395_s13 }
  0x6f   : > { %p840_p10 = scmp.ne.s32.totalorder %s1434_s29, %s839_s0  ;;  %p847_p1 = scmp.lt.s32.totalorder %s1423_s11, %s839_s0 }
  0x71   : > { %p841_p11 = pnand %p840_p10, %p680_p12  ;;  %p848_p8 = por %p847_p1, %p846_p13 }
  0x73   : > { %p842_p0 = pneg %p841_p11 }
  0x75   : > { %p849_p2 = pnand %p848_p8, %p842_p0 }
  0x77   : > { %852 = shalt.err (!%p849_p2)  }
  0x78   : > { %637 = dma.hbm_to_vmem [thread:$0]  (%p680_p12), %s175_s10, 16, %s1434_s29, [#allocation3] }
  0x79   : > { %s1478_s21 = sld [smem:[#allocation5 + $0x4]]  ;;  %s1282_s23 = smov [#allocation2 + $0x3]  }
  0x7a   : > { %s200_s25 = sshll.u32 %s1282_s23, 4  ;;  %s1283_s6 = smov [#allocation2 + $0x4]   ;;  %s201_s25 = int_to_ptr.vmem [resolvable:$true] %s200_s25 }
  0x7b   : > { %s216_s7 = sshll.u32 %s1283_s6, 4  ;;  %s853_s12 = scalar_lea.hbm %s1460_s28, 16  ;;  %s217_s7 = int_to_ptr.vmem [resolvable:$true] %s216_s7 }
  0x7c   : > { %p854_p3 = scmp.ne.s32.totalorder %s1460_s28, %s853_s12  ;;  %p858_p7 = scmp.lt.s32.totalorder %s1460_s28, %s1843_s1 }
  0x7d   : > { %p859_p9 = scmp.lt.s32.totalorder %s1412_s8, %s853_s12 }
  0x7e   : > { %p855_p5 = pnand %p854_p3, %p680_p12 }
  0x7f   : > { %p860_p10 = por %p859_p9, %p858_p7 }
  0x80   : > { %p856_p6 = pneg %p855_p5 }
  0x82   : > { %p861_p11 = pnand %p860_p10, %p856_p6 }
  0x84   : > { %864 = shalt.err (!%p861_p11)  }
  0x85   : > { %s865_s29 = scalar_lea.vmem %s201_s25, 16  ;;  %p872_p8 = scmp.lt.s32.totalorder %s201_s25, %s1395_s13 }
  0x86   : > { %p866_p0 = scmp.ne.s32.totalorder %s201_s25, %s865_s29  ;;  %p873_p2 = scmp.lt.s32.totalorder %s1423_s11, %s865_s29 }
  0x88   : > { %p867_p13 = pnand %p866_p0, %p680_p12  ;;  %p874_p3 = por %p873_p2, %p872_p8 }
  0x8a   : > { %p868_p1 = pneg %p867_p13 }
  0x8c   : > { %p875_p5 = pnand %p874_p3, %p868_p1 }
  0x8e   : > { %878 = shalt.err (!%p875_p5)  }
  0x8f   : > { %638 = dma.hbm_to_vmem [thread:$0]  (%p680_p12), %s1460_s28, 16, %s201_s25, [#allocation3] }
  0x90   : > { %s1496_s10 = sld [smem:[#allocation5 + $0x5]]  ;;  %s596_s30 = sshll.u32 %s1478_s21, 4 }
  0x91   : > { %s1498_s22 = sld [smem:[#allocation5 + $0x6]]  ;;  %s1284_s4 = smov [#allocation2 + $0x5]  }
  0x92   : > { %s232_s5 = sshll.u32 %s1284_s4, 4  ;;  %s207_s6 = scalar_lea.hbm %s1843_s1, %s596_s30  ;;  %s1504_s5 = int_to_ptr.vmem [resolvable:$true] %s232_s5 }
  0x93   : > { %s879_s12 = scalar_lea.hbm %s207_s6, 16  ;;  %p884_p10 = scmp.lt.s32.totalorder %s207_s6, %s1843_s1 }
  0x94   : > { %p880_p6 = scmp.ne.s32.totalorder %s207_s6, %s879_s12  ;;  %p885_p11 = scmp.lt.s32.totalorder %s1412_s8, %s879_s12 }
  0x96   : > { %p881_p7 = pnand %p880_p6, %p680_p12  ;;  %p886_p0 = por %p885_p11, %p884_p10 }
  0x98   : > { %p882_p9 = pneg %p881_p7 }
  0x9a   : > { %p887_p13 = pnand %p886_p0, %p882_p9 }
  0x9c   : > { %890 = shalt.err (!%p887_p13)  }
  0x9d   : > { %s891_s21 = scalar_lea.vmem %s217_s7, 16  ;;  %p898_p3 = scmp.lt.s32.totalorder %s217_s7, %s1395_s13 }
  0x9e   : > { %p892_p1 = scmp.ne.s32.totalorder %s217_s7, %s891_s21  ;;  %p899_p5 = scmp.lt.s32.totalorder %s1423_s11, %s891_s21 }
  0xa0   : > { %p893_p8 = pnand %p892_p1, %p680_p12  ;;  %p900_p6 = por %p899_p5, %p898_p3 }
  0xa2   : > { %p894_p2 = pneg %p893_p8 }
  0xa4   : > { %p901_p7 = pnand %p900_p6, %p894_p2 }
  0xa6   : > { %904 = shalt.err (!%p901_p7)  }
  0xa7   : > { %639 = dma.hbm_to_vmem [thread:$0]  (%p680_p12), %s207_s6, 16, %s217_s7, [#allocation3] }
  0xa8   : > { %s1518_s14 = sld [smem:[#allocation5 + $0x7]]  ;;  %s598_s2 = sshll.u32 %s1496_s10, 4 }
  0xa9   : > { %s1285_s29 = smov [#allocation2 + $0x6]   ;;  %s223_s23 = scalar_lea.hbm %s1843_s1, %s598_s2 }
  0xaa   : > { %s248_s30 = sshll.u32 %s1285_s29, 4  ;;  %s600_s12 = sshll.u32 %s1498_s22, 4  ;;  %s249_s30 = int_to_ptr.vmem [resolvable:$true] %s248_s30 }
  0xab   : > { %s905_s28 = scalar_lea.hbm %s223_s23, 16  ;;  %p910_p0 = scmp.lt.s32.totalorder %s223_s23, %s1843_s1 }
  0xac   : > { %p906_p9 = scmp.ne.s32.totalorder %s223_s23, %s905_s28  ;;  %p911_p13 = scmp.lt.s32.totalorder %s1412_s8, %s905_s28 }
  0xae   : > { %p907_p10 = pnand %p906_p9, %p680_p12  ;;  %p912_p1 = por %p911_p13, %p910_p0 }
  0xb0   : > { %p908_p11 = pneg %p907_p10 }
  0xb2   : > { %p913_p8 = pnand %p912_p1, %p908_p11 }
  0xb4   : > { %916 = shalt.err (!%p913_p8)  }
  0xb5   : > { %s917_s7 = scalar_lea.vmem %s1504_s5, 16  ;;  %p924_p6 = scmp.lt.s32.totalorder %s1504_s5, %s1395_s13 }
  0xb6   : > { %p918_p2 = scmp.ne.s32.totalorder %s1504_s5, %s917_s7  ;;  %p925_p7 = scmp.lt.s32.totalorder %s1423_s11, %s917_s7 }
  0xb8   : > { %p919_p3 = pnand %p918_p2, %p680_p12  ;;  %p926_p9 = por %p925_p7, %p924_p6 }
  0xba   : > { %p920_p5 = pneg %p919_p3 }
  0xbc   : > { %p927_p10 = pnand %p926_p9, %p920_p5 }
  0xbe   : > { %930 = shalt.err (!%p927_p10)  }
  0xbf   : > { %640 = dma.hbm_to_vmem [thread:$0]  (%p680_p12), %s223_s23, 16, %s1504_s5, [#allocation3] }
  0xc0   : > { %s239_s6 = scalar_lea.hbm %s1843_s1, %s600_s12 }
  0xc1   : > { %s931_s2 = scalar_lea.hbm %s239_s6, 16  ;;  %p936_p1 = scmp.lt.s32.totalorder %s239_s6, %s1843_s1 }
  0xc2   : > { %p932_p11 = scmp.ne.s32.totalorder %s239_s6, %s931_s2  ;;  %p937_p8 = scmp.lt.s32.totalorder %s1412_s8, %s931_s2 }
  0xc4   : > { %p933_p0 = pnand %p932_p11, %p680_p12  ;;  %p938_p2 = por %p937_p8, %p936_p1 }
  0xc6   : > { %p934_p13 = pneg %p933_p0 }
  0xc8   : > { %p939_p3 = pnand %p938_p2, %p934_p13 }
  0xca   : > { %942 = shalt.err (!%p939_p3)  }
  0xcb   : > { %s943_s0 = scalar_lea.vmem %s249_s30, 16  ;;  %p950_p9 = scmp.lt.s32.totalorder %s249_s30, %s1395_s13 }
  0xcc   : > { %p944_p5 = scmp.ne.s32.totalorder %s249_s30, %s943_s0  ;;  %p951_p10 = scmp.lt.s32.totalorder %s1423_s11, %s943_s0 }
  0xce   : > { %p945_p6 = pnand %p944_p5, %p680_p12  ;;  %p952_p11 = por %p951_p10, %p950_p9 }
  0xd0   : > { %p946_p7 = pneg %p945_p6 }
  0xd2   : > { %p953_p0 = pnand %p952_p11, %p946_p7 }
  0xd4   : > { %956 = shalt.err (!%p953_p0)  }
  0xd5   : > { %641 = dma.hbm_to_vmem [thread:$0]  (%p680_p12), %s239_s6, 16, %s249_s30, [#allocation3] }
  0xd6   : > { %s602_s5 = sshll.u32 %s1518_s14, 4  ;;  %s1286_s25 = smov [#allocation2 + $0x7]  }
  0xd7   : > { %s255_s28 = scalar_lea.hbm %s1843_s1, %s602_s5  ;;  %s264_s21 = sshll.u32 %s1286_s25, 4  ;;  %s265_s21 = int_to_ptr.vmem [resolvable:$true] %s264_s21 }
  0xd8   : > { %s1561_s7 = sand.u32 1, %s1267_s18  ;;  %s957_s10 = scalar_lea.hbm %s255_s28, 16 }
  0xd9   : > { %p958_p13 = scmp.ne.s32.totalorder %s255_s28, %s957_s10  ;;  %p962_p2 = scmp.lt.s32.totalorder %s255_s28, %s1843_s1 }
  0xda   : > { %p963_p3 = scmp.lt.s32.totalorder %s1412_s8, %s957_s10 }
  0xdb   : > { %p959_p1 = pnand %p958_p13, %p680_p12 }
  0xdc   : > { %p964_p5 = por %p963_p3, %p962_p2 }
  0xdd   : > { %p960_p8 = pneg %p959_p1 }
  0xdf   : > { %p965_p6 = pnand %p964_p5, %p960_p8 }
  0xe1   : > { %968 = shalt.err (!%p965_p6)  }
  0xe2   : > { %s969_s14 = scalar_lea.vmem %s265_s21, 16  ;;  %p976_p11 = scmp.lt.s32.totalorder %s265_s21, %s1395_s13 }
  0xe3   : > { %p970_p7 = scmp.ne.s32.totalorder %s265_s21, %s969_s14  ;;  %p977_p0 = scmp.lt.s32.totalorder %s1423_s11, %s969_s14 }
  0xe5   : > { %p971_p9 = pnand %p970_p7, %p680_p12  ;;  %p978_p13 = por %p977_p0, %p976_p11 }
  0xe7   : > { %p972_p10 = pneg %p971_p9 }
  0xe9   : > { %p979_p1 = pnand %p978_p13, %p972_p10 }
  0xeb   : > { %982 = shalt.err (!%p979_p1)  }
  0xec   : > { %642 = dma.hbm_to_vmem [thread:$0]  (%p680_p12), %s255_s28, 16, %s265_s21, [#allocation3] }
  0xed   : > { %s268_s30 = sadd.s32 1, %s1267_s18  ;;  %s273_s6 = ssub.s32 1, %s1561_s7 }
  0xee   : > { %p1577_p8 = scmp.lt.s32.totalorder %s268_s30, 2  ;;  %s628_s4 = sshll.u32 %s1267_s18, 3 }
  0xef   : > { %s605_s0 = sshll.u32 %s273_s6, 3  ;;  %s1582_s5 = sadd.s32 8, %s628_s4 }
  0xf0   : > { %s644_s23 = scalar_select %p1577_p8, [#allocation5], [#allocation44] }
  0xf1   : > { %s645_s12 = scalar_select %p1577_p8, %s1582_s5, 0 }
  0xf2   : > { %s1589_s28 = scalar_lea.vmem [#allocation2], %s605_s0  ;;  %s294_s22 = sadd.s32 1, %s1582_s5 }
  0xf3   : > { %s290_s25 = sshll.u32 %s1589_s28, 4  ;;  %s278_s21 = sld [smem:[%s644_s23 + %s645_s12]]  ;;  %s1592_s25 = int_to_ptr.vmem [resolvable:$true] %s290_s25 }
  0xf4   : > { %s647_s2 = scalar_select %p1577_p8, [#allocation5], [#allocation45] }
  0xf5   : > { %s1880_s22 = smov (!%p1577_p8, %s294_s22), 0  ;;  %s505_s14 = scalar_lea.vmem %s1589_s28, 1 [#allocation2] }
  0xf6   : > { %s311_s30 = sadd.s32 2, %s1582_s5  ;;  %s1602_s19 = sld [smem:[%s647_s2 + %s1880_s22]] }
  0xf7   : > { %s307_s26 = sshll.u32 %s505_s14, 4  ;;  %s1607_s23 = scalar_lea.sflag [#allocation3], %s273_s6  ;;  %s308_s26 = int_to_ptr.vmem [resolvable:$true] %s307_s26 }
  0xf9   : > { %s606_s4 = sshll.u32 %s278_s21, 4 }
  0xfa   : > { %s280_s17 = scalar_lea.hbm %s1843_s1, %s606_s4 }
  0xfb   : > { %s983_s12 = scalar_lea.hbm %s280_s17, 16  ;;  %p988_p5 = scmp.lt.s32.totalorder %s280_s17, %s1843_s1 }
  0xfc   : > { %p984_p12 = scmp.ne.s32.totalorder %s280_s17, %s983_s12  ;;  %p989_p6 = scmp.lt.s32.totalorder %s1412_s8, %s983_s12 }
  0xfe   : > { %p985_p2 = pnand %p984_p12, %p1577_p8  ;;  %p990_p7 = por %p989_p6, %p988_p5 }
 0x100   : > { %p986_p3 = pneg %p985_p2 }
 0x102   : > { %p991_p9 = pnand %p990_p7, %p986_p3 }
 0x104   : > { %994 = shalt.err (!%p991_p9)  }
 0x105   : > { %s995_s27 = scalar_lea.vmem %s1592_s25, 16  ;;  %p1002_p13 = scmp.lt.s32.totalorder %s1592_s25, %s1395_s13 }
 0x106   : > { %p996_p10 = scmp.ne.s32.totalorder %s1592_s25, %s995_s27  ;;  %p1003_p1 = scmp.lt.s32.totalorder %s1423_s11, %s995_s27 }
 0x108   : > { %p997_p11 = pnand %p996_p10, %p1577_p8  ;;  %p1004_p12 = por %p1003_p1, %p1002_p13 }
 0x10a   : > { %p998_p0 = pneg %p997_p11 }
 0x10c   : > { %p1005_p2 = pnand %p1004_p12, %p998_p0 }
 0x10e   : > { %1008 = shalt.err (!%p1005_p2)  }
 0x10f   : > { %646 = dma.hbm_to_vmem [thread:$0]  (%p1577_p8), %s280_s17, 16, %s1592_s25, %s1607_s23 }
 0x110   : > { %s510_s15 = scalar_lea.vmem %s1589_s28, 2 [#allocation2]  ;;  %s1882_s30 = smov (!%p1577_p8, %s311_s30), 0 }
 0x111   : > { %s650_s6 = scalar_select %p1577_p8, [#allocation5], [#allocation46] }
 0x112   : > { %s607_s21 = sshll.u32 %s1602_s19, 4  ;;  %s324_s10 = sshll.u32 %s510_s15, 4  ;;  %s1650_s10 = int_to_ptr.vmem [resolvable:$true] %s324_s10 }
 0x113   : > { %s298_s14 = scalar_lea.hbm %s1843_s1, %s607_s21  ;;  %s1635_s4 = sld [smem:[%s650_s6 + %s1882_s30]] }
 0x114   : > { %s1009_s0 = scalar_lea.hbm %s298_s14, 16  ;;  %p1014_p7 = scmp.lt.s32.totalorder %s298_s14, %s1843_s1 }
 0x115   : > { %p1010_p3 = scmp.ne.s32.totalorder %s298_s14, %s1009_s0  ;;  %p1015_p9 = scmp.lt.s32.totalorder %s1412_s8, %s1009_s0 }
 0x117   : > { %p1011_p5 = pnand %p1010_p3, %p1577_p8  ;;  %p1016_p10 = por %p1015_p9, %p1014_p7 }
 0x119   : > { %p1012_p6 = pneg %p1011_p5 }
 0x11b   : > { %p1017_p11 = pnand %p1016_p10, %p1012_p6 }
 0x11d   : > { %1020 = shalt.err (!%p1017_p11)  }
 0x11e   : > { %s1021_s19 = scalar_lea.vmem %s308_s26, 16  ;;  %p1028_p12 = scmp.lt.s32.totalorder %s308_s26, %s1395_s13 }
 0x11f   : > { %p1022_p0 = scmp.ne.s32.totalorder %s308_s26, %s1021_s19  ;;  %p1029_p2 = scmp.lt.s32.totalorder %s1423_s11, %s1021_s19 }
 0x121   : > { %p1023_p13 = pnand %p1022_p0, %p1577_p8  ;;  %p1030_p3 = por %p1029_p2, %p1028_p12 }
 0x123   : > { %p1024_p1 = pneg %p1023_p13 }
 0x125   : > { %p1031_p5 = pnand %p1030_p3, %p1024_p1 }
 0x127   : > { %1034 = shalt.err (!%p1031_p5)  }
 0x128   : > { %649 = dma.hbm_to_vmem [thread:$0]  (%p1577_p8), %s298_s14, 16, %s308_s26, %s1607_s23 }
 0x129   : > { %s328_s30 = sadd.s32 3, %s1582_s5  ;;  %s515_s27 = scalar_lea.vmem %s1589_s28, 3 [#allocation2] }
 0x12a   : > { %s653_s12 = scalar_select %p1577_p8, [#allocation5], [#allocation47] }
 0x12b   : > { %s1884_s30 = smov (!%p1577_p8, %s328_s30), 0  ;;  %s345_s15 = sadd.s32 4, %s1582_s5 }
 0x12c   : > { %s609_s6 = sshll.u32 %s1635_s4, 4  ;;  %s1660_s21 = sld [smem:[%s653_s12 + %s1884_s30]] }
 0x12d   : > { %s315_s0 = scalar_lea.hbm %s1843_s1, %s609_s6  ;;  %s341_s17 = sshll.u32 %s515_s27, 4  ;;  %s342_s17 = int_to_ptr.vmem [resolvable:$true] %s341_s17 }
 0x12e   : > { %s1035_s25 = scalar_lea.hbm %s315_s0, 16  ;;  %p1040_p10 = scmp.lt.s32.totalorder %s315_s0, %s1843_s1 }
 0x12f   : > { %p1036_p6 = scmp.ne.s32.totalorder %s315_s0, %s1035_s25  ;;  %p1041_p11 = scmp.lt.s32.totalorder %s1412_s8, %s1035_s25 }
 0x131   : > { %p1037_p7 = pnand %p1036_p6, %p1577_p8  ;;  %p1042_p0 = por %p1041_p11, %p1040_p10 }
 0x133   : > { %p1038_p9 = pneg %p1037_p7 }
 0x135   : > { %p1043_p13 = pnand %p1042_p0, %p1038_p9 }
 0x137   : > { %1046 = shalt.err (!%p1043_p13)  }
 0x138   : > { %s1047_s4 = scalar_lea.vmem %s1650_s10, 16  ;;  %p1054_p3 = scmp.lt.s32.totalorder %s1650_s10, %s1395_s13 }
 0x139   : > { %p1048_p1 = scmp.ne.s32.totalorder %s1650_s10, %s1047_s4  ;;  %p1055_p5 = scmp.lt.s32.totalorder %s1423_s11, %s1047_s4 }
 0x13b   : > { %p1049_p12 = pnand %p1048_p1, %p1577_p8  ;;  %p1056_p6 = por %p1055_p5, %p1054_p3 }
 0x13d   : > { %p1050_p2 = pneg %p1049_p12 }
 0x13f   : > { %p1057_p7 = pnand %p1056_p6, %p1050_p2 }
 0x141   : > { %1060 = shalt.err (!%p1057_p7)  }
 0x142   : > { %652 = dma.hbm_to_vmem [thread:$0]  (%p1577_p8), %s315_s0, 16, %s1650_s10, %s1607_s23 }
 0x143   : > { %s520_s19 = scalar_lea.vmem %s1589_s28, 4 [#allocation2]  ;;  %s1886_s15 = smov (!%p1577_p8, %s345_s15), 0 }
 0x144   : > { %s656_s30 = scalar_select %p1577_p8, [#allocation5], [#allocation48] }
 0x145   : > { %s611_s12 = sshll.u32 %s1660_s21, 4  ;;  %s358_s27 = sshll.u32 %s520_s19, 4  ;;  %s1706_s27 = int_to_ptr.vmem [resolvable:$true] %s358_s27 }
 0x146   : > { %s332_s2 = scalar_lea.hbm %s1843_s1, %s611_s12  ;;  %s1691_s25 = sld [smem:[%s656_s30 + %s1886_s15]] }
 0x147   : > { %s1061_s26 = scalar_lea.hbm %s332_s2, 16  ;;  %p1066_p0 = scmp.lt.s32.totalorder %s332_s2, %s1843_s1 }
 0x148   : > { %p1062_p9 = scmp.ne.s32.totalorder %s332_s2, %s1061_s26  ;;  %p1067_p13 = scmp.lt.s32.totalorder %s1412_s8, %s1061_s26 }
 0x14a   : > { %p1063_p10 = pnand %p1062_p9, %p1577_p8  ;;  %p1068_p1 = por %p1067_p13, %p1066_p0 }
 0x14c   : > { %p1064_p11 = pneg %p1063_p10 }
 0x14e   : > { %p1069_p12 = pnand %p1068_p1, %p1064_p11 }
 0x150   : > { %1072 = shalt.err (!%p1069_p12)  }
 0x151   : > { %s1073_s21 = scalar_lea.vmem %s342_s17, 16  ;;  %p1080_p6 = scmp.lt.s32.totalorder %s342_s17, %s1395_s13 }
 0x152   : > { %p1074_p2 = scmp.ne.s32.totalorder %s342_s17, %s1073_s21  ;;  %p1081_p7 = scmp.lt.s32.totalorder %s1423_s11, %s1073_s21 }
 0x154   : > { %p1075_p3 = pnand %p1074_p2, %p1577_p8  ;;  %p1082_p9 = por %p1081_p7, %p1080_p6 }
 0x156   : > { %p1076_p5 = pneg %p1075_p3 }
 0x158   : > { %p1083_p10 = pnand %p1082_p9, %p1076_p5 }
 0x15a   : > { %1086 = shalt.err (!%p1083_p10)  }
 0x15b   : > { %655 = dma.hbm_to_vmem [thread:$0]  (%p1577_p8), %s332_s2, 16, %s342_s17, %s1607_s23 }
 0x15c   : > { %s362_s15 = sadd.s32 5, %s1582_s5  ;;  %s525_s4 = scalar_lea.vmem %s1589_s28, 5 [#allocation2] }
 0x15d   : > { %s659_s14 = scalar_select %p1577_p8, [#allocation5], [#allocation49] }
 0x15e   : > { %s1888_s15 = smov (!%p1577_p8, %s362_s15), 0  ;;  %s379_s19 = sadd.s32 6, %s1582_s5 }
 0x15f   : > { %s613_s30 = sshll.u32 %s1691_s25, 4  ;;  %s363_s12 = sld [smem:[%s659_s14 + %s1888_s15]] }
 0x160   : > { %s349_s26 = scalar_lea.hbm %s1843_s1, %s613_s30  ;;  %s375_s10 = sshll.u32 %s525_s4, 4  ;;  %s376_s10 = int_to_ptr.vmem [resolvable:$true] %s375_s10 }
 0x161   : > { %s1087_s0 = scalar_lea.hbm %s349_s26, 16  ;;  %p1092_p1 = scmp.lt.s32.totalorder %s349_s26, %s1843_s1 }
 0x162   : > { %p1088_p11 = scmp.ne.s32.totalorder %s349_s26, %s1087_s0  ;;  %p1093_p12 = scmp.lt.s32.totalorder %s1412_s8, %s1087_s0 }
 0x164   : > { %p1089_p0 = pnand %p1088_p11, %p1577_p8  ;;  %p1094_p2 = por %p1093_p12, %p1092_p1 }
 0x166   : > { %p1090_p13 = pneg %p1089_p0 }
 0x168   : > { %p1095_p3 = pnand %p1094_p2, %p1090_p13 }
 0x16a   : > { %1098 = shalt.err (!%p1095_p3)  }
 0x16b   : > { %s1099_s25 = scalar_lea.vmem %s1706_s27, 16  ;;  %p1106_p9 = scmp.lt.s32.totalorder %s1706_s27, %s1395_s13 }
 0x16c   : > { %p1100_p5 = scmp.ne.s32.totalorder %s1706_s27, %s1099_s25  ;;  %p1107_p10 = scmp.lt.s32.totalorder %s1423_s11, %s1099_s25 }
 0x16e   : > { %p1101_p6 = pnand %p1100_p5, %p1577_p8  ;;  %p1108_p11 = por %p1107_p10, %p1106_p9 }
 0x170   : > { %p1102_p7 = pneg %p1101_p6 }
 0x172   : > { %p1109_p0 = pnand %p1108_p11, %p1102_p7 }
 0x174   : > { %1112 = shalt.err (!%p1109_p0)  }
 0x175   : > { %658 = dma.hbm_to_vmem [thread:$0]  (%p1577_p8), %s349_s26, 16, %s1706_s27, %s1607_s23 }
 0x176   : > { %s662_s21 = scalar_select %p1577_p8, [#allocation5], [#allocation50] }
 0x177   : > { %s1890_s19 = smov (!%p1577_p8, %s379_s19), 0  ;;  %s615_s15 = sshll.u32 %s363_s12, 4 }
 0x178   : > { %s530_s14 = scalar_lea.vmem %s1589_s28, 6 [#allocation2]  ;;  %s366_s6 = scalar_lea.hbm %s1843_s1, %s615_s15 }
 0x179   : > { %s1744_s22 = sld [smem:[%s662_s21 + %s1890_s19]]  ;;  %s1113_s0 = scalar_lea.hbm %s366_s6, 16 }
 0x17a   : > { %p1114_p13 = scmp.ne.s32.totalorder %s366_s6, %s1113_s0  ;;  %p1118_p2 = scmp.lt.s32.totalorder %s366_s6, %s1843_s1 }
 0x17b   : > { %p1119_p3 = scmp.lt.s32.totalorder %s1412_s8, %s1113_s0 }
 0x17c   : > { %p1115_p1 = pnand %p1114_p13, %p1577_p8 }
 0x17d   : > { %p1120_p5 = por %p1119_p3, %p1118_p2 }
 0x17e   : > { %p1116_p12 = pneg %p1115_p1 }
 0x180   : > { %p1121_p6 = pnand %p1120_p5, %p1116_p12 }
 0x182   : > { %1124 = shalt.err (!%p1121_p6)  }
 0x183   : > { %s1125_s12 = scalar_lea.vmem %s376_s10, 16  ;;  %p1132_p11 = scmp.lt.s32.totalorder %s376_s10, %s1395_s13 }
 0x184   : > { %p1126_p7 = scmp.ne.s32.totalorder %s376_s10, %s1125_s12  ;;  %p1133_p0 = scmp.lt.s32.totalorder %s1423_s11, %s1125_s12 }
 0x186   : > { %p1127_p9 = pnand %p1126_p7, %p1577_p8  ;;  %p1134_p13 = por %p1133_p0, %p1132_p11 }
 0x188   : > { %p1128_p10 = pneg %p1127_p9 }
 0x18a   : > { %p1135_p1 = pnand %p1134_p13, %p1128_p10 }
 0x18c   : > { %1138 = shalt.err (!%p1135_p1)  }
 0x18d   : > { %661 = dma.hbm_to_vmem [thread:$0]  (%p1577_p8), %s366_s6, 16, %s376_s10, %s1607_s23 }
 0x18e   : > { %s392_s19 = sshll.u32 %s530_s14, 4  ;;  %s396_s26 = sadd.s32 7, %s1582_s5  ;;  %s393_s19 = int_to_ptr.vmem [resolvable:$true] %s392_s19 }
 0x18f   : > { %s665_s2 = scalar_select %p1577_p8, [#allocation5], [#allocation51] }
 0x190   : > { %s1892_s26 = smov (!%p1577_p8, %s396_s26), 0  ;;  %s535_s25 = scalar_lea.vmem %s1589_s28, 7 [#allocation2] }
 0x191   : > { %s617_s21 = sshll.u32 %s1744_s22, 4  ;;  %s397_s15 = sld [smem:[%s665_s2 + %s1892_s26]] }
 0x192   : > { %s383_s0 = scalar_lea.hbm %s1843_s1, %s617_s21  ;;  %s409_s17 = sshll.u32 %s535_s25, 4  ;;  %s410_s17 = int_to_ptr.vmem [resolvable:$true] %s409_s17 }
 0x193   : > { %s1139_s27 = scalar_lea.hbm %s383_s0, 16  ;;  %p1144_p5 = scmp.lt.s32.totalorder %s383_s0, %s1843_s1 }
 0x194   : > { %p1140_p12 = scmp.ne.s32.totalorder %s383_s0, %s1139_s27  ;;  %p1145_p6 = scmp.lt.s32.totalorder %s1412_s8, %s1139_s27 }
 0x196   : > { %p1141_p2 = pnand %p1140_p12, %p1577_p8  ;;  %p1146_p7 = por %p1145_p6, %p1144_p5 }
 0x198   : > { %p1142_p3 = pneg %p1141_p2 }
 0x19a   : > { %p1147_p9 = pnand %p1146_p7, %p1142_p3 }
 0x19c   : > { %1150 = shalt.err (!%p1147_p9)  }
 0x19d   : > { %s1151_s28 = scalar_lea.vmem %s393_s19, 16  ;;  %p1158_p13 = scmp.lt.s32.totalorder %s393_s19, %s1395_s13 }
 0x19e   : > { %p1152_p10 = scmp.ne.s32.totalorder %s393_s19, %s1151_s28  ;;  %p1159_p1 = scmp.lt.s32.totalorder %s1423_s11, %s1151_s28 }
 0x1a0   : > { %p1153_p11 = pnand %p1152_p10, %p1577_p8  ;;  %p1160_p12 = por %p1159_p1, %p1158_p13 }
 0x1a2   : > { %p1154_p0 = pneg %p1153_p11 }
 0x1a4   : > { %p1161_p2 = pnand %p1160_p12, %p1154_p0 }
 0x1a6   : > { %1164 = shalt.err (!%p1161_p2)  }
 0x1a7   : > { %664 = dma.hbm_to_vmem [thread:$0]  (%p1577_p8), %s383_s0, 16, %s393_s19, %s1607_s23 }
 0x1a8   : > { %s619_s14 = sshll.u32 %s397_s15, 4 }
 0x1a9   : > { %s400_s12 = scalar_lea.hbm %s1843_s1, %s619_s14 }
 0x1aa   : > { %s1165_s26 = scalar_lea.hbm %s400_s12, 16  ;;  %p1170_p7 = scmp.lt.s32.totalorder %s400_s12, %s1843_s1 }
 0x1ab   : > { %p1166_p3 = scmp.ne.s32.totalorder %s400_s12, %s1165_s26  ;;  %p1171_p9 = scmp.lt.s32.totalorder %s1412_s8, %s1165_s26 }
 0x1ad   : > { %p1167_p5 = pnand %p1166_p3, %p1577_p8  ;;  %p1172_p10 = por %p1171_p9, %p1170_p7 }
 0x1af   : > { %p1168_p6 = pneg %p1167_p5 }
 0x1b1   : > { %p1173_p11 = pnand %p1172_p10, %p1168_p6 }
 0x1b3   : > { %1176 = shalt.err (!%p1173_p11)  }
 0x1b4   : > { %s1177_s19 = scalar_lea.vmem %s410_s17, 16  ;;  %p1184_p12 = scmp.lt.s32.totalorder %s410_s17, %s1395_s13 }
 0x1b5   : > { %p1178_p0 = scmp.ne.s32.totalorder %s410_s17, %s1177_s19  ;;  %p1185_p2 = scmp.lt.s32.totalorder %s1423_s11, %s1177_s19 }
 0x1b7   : > { %p1179_p13 = pnand %p1178_p0, %p1577_p8  ;;  %p1186_p3 = por %p1185_p2, %p1184_p12 }
 0x1b9   : > { %p1180_p1 = pneg %p1179_p13 }
 0x1bb   : > { %p1187_p5 = pnand %p1186_p3, %p1180_p1 }
 0x1bd   : > { %1190 = shalt.err (!%p1187_p5)  }
 0x1be   : > { %667 = dma.hbm_to_vmem [thread:$0]  (%p1577_p8), %s400_s12, 16, %s410_s17, %s1607_s23 }
 0x1bf   : > { %s134_s8 = scalar_lea.vmem [#allocation9], %s1390_s9  ;;  %s1865_s21 = sshll.u32 %s1561_s7, 3 }
 0x1c0   : > { %s414_s15 = scalar_lea.vmem [#allocation2], %s1865_s21  ;;  %s415_s4 = scalar_lea.sflag [#allocation3], %s1561_s7 }
 0x1c1   : > { %1247 = dma.done.wait %s415_s4, 128 }
 0x1c2   : > { %1248 = vsyncadd %s415_s4, 4294967168  ;;  %s623_s13 = sshll.u32 %s1267_s18, 7  ;;  %s438_s11 = sshll.u32 %s134_s8, 4  ;;  %v419_v0 = vld [vmem:[%s414_s15] sm:$0xff]  ;;  %v420_v1 = vld [vmem:[#allocation6] sm:$0xff]  ;;  %s439_s11 = int_to_ptr.vmem [resolvable:$true] %s438_s11 }
 0x1c3   : > { %v421_v2 = vadd.f32 %v420_v1, %v419_v0  ;;  %s436_s0 = scalar_lea.hbm %s1845_s3, %s623_s13  ;;  %s1866_s9 = sand.u32 1, %s1259_s16  }
 0x1c4   : > { %s424_s23 = scalar_lea.sflag [#allocation8], %s1866_s9  ;;  %s1191_s17 = scalar_lea.vmem %s439_s11, 128 }
 0x1c5   : > { %422 = vst [vmem:[%s134_s8] sm:$0xff] %v421_v2  ;;  %p1192_p8 = scmp.ne.s32.totalorder %s439_s11, %s1191_s17  ;;  %s1287_s7 = smov [#allocation9]  }
 0x1c6   : > { %s1195_s27 = sshll.u32 %s1287_s7, 4  ;;  %s1196_s27 = int_to_ptr.vmem [resolvable:$false] %s1195_s27 }
 0x1c7   : > { %p1193_p6 = pnand %p1192_p8, %p1351_p4  ;;  %s1197_s18 = scalar_lea.vmem %s1196_s27, 256 }
 0x1c8   : > { %p1198_p9 = scmp.lt.s32.totalorder %s439_s11, %s1196_s27  ;;  %p1199_p10 = scmp.lt.s32.totalorder %s1197_s18, %s1191_s17 }
 0x1c9   : > { %p1194_p7 = pneg %p1193_p6 }
 0x1ca   : > { %p1200_p11 = por %p1199_p10, %p1198_p9 }
 0x1cc   : > { %p1201_p0 = pnand %p1200_p11, %p1194_p7 }
 0x1ce   : > { %1204 = shalt.err (!%p1201_p0)
}
 0x1cf   : > { %s1205_s10 = scalar_lea.hbm %s436_s0, 128  ;;  %s1209_s14 = scalar_lea.hbm %s1845_s3, 256 }
 0x1d0   : > { %p1206_p13 = scmp.ne.s32.totalorder %s436_s0, %s1205_s10  ;;  %p1210_p2 = scmp.lt.s32.totalorder %s436_s0, %s1845_s3 }
 0x1d1   : > { %p1211_p3 = scmp.lt.s32.totalorder %s1209_s14, %s1205_s10 }
 0x1d2   : > { %p1207_p1 = pnand %p1206_p13, %p1351_p4 }
 0x1d3   : > { %p1212_p5 = por %p1211_p3, %p1210_p2 }
 0x1d4   : > { %p1208_p12 = pneg %p1207_p1 }
 0x1d6   : > { %p1213_p8 = pnand %p1212_p5, %p1208_p12 }
 0x1d8   : > { %1216 = shalt.err (!%p1213_p8)
}
 0x1d9   : > { %668 = dma.vmem_to_hbm [thread:$0]  (%p1351_p4), %s439_s11, 128, %s436_s0, %s424_s23  }
 0x1da PF: > { %s1867_s12 = sld [smem:[#allocation56_spill]]  ;;  %p682_p6 = scmp.ge.s32.totalorder %s1275_s20, 2 }
 0x1db   : > { %s1868_s26 = sld [smem:[#allocation60_spill]] }
 0x1e0   : > { %s450_s2 = sand.u32 1, %s1867_s12  }
 0x1e1   : > { %p1869_p7 = scmp.ne.s32.totalorder %s1868_s26, 0  ;;  %s451_s25 = scalar_lea.sflag [#allocation8], %s450_s2 }
 0x1e3   : > { %p675_p9 = pnand %p682_p6, %p1869_p7 }
 0x1e5   : > { %p676_p10 = pneg %p675_p9 }
 0x1e7   : > { %1250 = dma.done.wait (%p676_p10), %s451_s25, 128  }
 0x1e8   : > { %1252 = vsyncadd (%p676_p10), %s451_s25, 4294967168  ;;  %s21_s20 = sadd.s32 1, %s1275_s20   ;;  %s1870_s19 = sld [smem:[#allocation57_spill]] }
 0x1e9   : > { %p18_p11 = scmp.ge.s32.totalorder %s21_s20, 4   ;;  %s1871_s17 = sld [smem:[#allocation61_spill]] }
 0x1ea   : > { %s1872_s18 = sld [smem:[#allocation58_spill]]  ;;  %s1874_s15 = smov %s1259_s16 }
 0x1eb   : > { %s1873_s24 = sld [smem:[#allocation59_spill]] }
 0x1ed   :  { %20 = sbr.rel (!%p18_p11) target bundleno = 11 (0xb), region = 169 }
 0x1ee   : > { %s1875_s16 = smov %s1870_s19 }
 0x1f1   : > { %s1876_s19 = smov %s1873_s24 }
 0x1f2   :  { %456 = vsyncpa [#allocation7], 1 }
 0x1f3   :  { %458 = vsyncpa [#allocation7 + $0x1], 1 }
 0x1f4   :  { %459 = vsyncpa [#allocation8], 1 }
 0x1f5   :  { %461 = vsyncpa [#allocation8 + $0x1], 1 }
 0x1f6   :  { %462 = vsyncmov [#allocation3] }
 0x1f9   :  { %s463_s8 = vpop.sfrf %462 }
 0x1fa   :  { %p626_p4 = scmp.ne.s32.totalorder %s463_s8, 0 }
 0x1fc   :  { %467 = shalt.err (%p626_p4)  }
 0x1fd   :  { %469 = vsyncmov [#allocation3 + $0x1] }
 0x200   :  { %s470_s21 = vpop.sfrf %469 }
 0x201   :  { %p627_p0 = scmp.ne.s32.totalorder %s470_s21, 0 }
 0x203   :  { %474 = shalt.err (%p627_p0)  }

</bundles_post_ra>
